<compile_context>
chip_gen: v6e
topology: v6e:2x2x1
jax: 0.10.0
libtpu: 0.0.40
codegen_flags: <defaults>
</compile_context>

<pallas_src>
import functools
import math

import jax
import jax.numpy as jnp
from jax.experimental import pallas as pl
from jax.experimental.pallas import tpu as pltpu

# ---- model hyper-parameters (small, consistent with the module) -------------
BATCH = 2
SEQ = 8            # num_tokens == context_length
D_IN = 32
D_OUT = 32
NUM_HEADS = 4
HEAD_DIM = D_OUT // NUM_HEADS
DROP_RATE = 0.0    # nn.Dropout is identity in eval mode


def mha_kernel(x_ref, wqkv_ref, wo_ref, bo_ref, o_ref, *, num_heads):
    """Whole problem in one block.

    x_ref:    (B, T, D_IN)        VMEM
    wqkv_ref: (D_IN, 3*D_OUT)     fused Q|K|V projection weight
    wo_ref:   (D_OUT, D_OUT)
    bo_ref:   (1, D_OUT)
    o_ref:    (B, T, D_OUT)
    """
    B, T, d_in = x_ref.shape
    d_out = wo_ref.shape[0]
    hd = d_out // num_heads
    scale = 1.0 / math.sqrt(hd)

    # Flatten batch*seq for the projection matmul (layout-trivial reshape:
    # minor dim unchanged, leading dims merged).
    x2 = x_ref[...].reshape(B * T, d_in)

    # Fused QKV projection: one MXU push with N = 3*d_out.
    qkv = jnp.dot(x2, wqkv_ref[...], preferred_element_type=jnp.float32)
    qkv = qkv.reshape(B, T, 3 * d_out)

    # Only the 3 width-d_out third-slices remain (no per-head hd-wide slices).
    q_all = qkv[:, :, 0:d_out]                   # (B, T, d_out)
    k_all = qkv[:, :, d_out:2 * d_out]           # (B, T, d_out)
    v_all = qkv[:, :, 2 * d_out:3 * d_out]       # (B, T, d_out)

    # Hoisted constants (built once, reused by every head).
    lane = jax.lax.broadcasted_iota(jnp.int32, (1, 1, d_out), 2)
    row = jax.lax.broadcasted_iota(jnp.int32, (T, T), 0)
    col = jax.lax.broadcasted_iota(jnp.int32, (T, T), 1)
    causal = (col > row)[None]                   # (1, T, T), True -> masked
    # Finite large negative: exp underflows to exactly 0 after max-subtraction.
    # Valid because the causal mask never masks an entire row (diagonal kept).
    neg_big = jnp.finfo(jnp.float32).min

    # Full-width context accumulator (head contributions land in disjoint lanes).
    ctx = jnp.zeros((B, T, d_out), dtype=jnp.float32)

    # Static head loop (num_heads=4), batched over B via leading-batch-dim
    # dot_generals.  Per-head Q/V isolation is done with VALU lane masks; the
    # contraction over the full d_out lanes is MXU-equivalent at these sizes
    # and keeps the XLU free for the softmax reductions.
    for h in range(num_heads):
        lo = h * hd
        in_head = (lane >= lo) & (lane < lo + hd)            # (1, 1, d_out)
        qmask = jnp.where(in_head, scale, 0.0)               # scale folded in

        # scores_h = (q * scale) @ k_h^T: masked-lane products are zero, so
        # contracting all d_out lanes equals the per-head hd contraction.
        s = jax.lax.dot_general(
            q_all * qmask, k_all,
            dimension_numbers=(((2,), (2,)), ((0,), (0,))),
            preferred_element_type=jnp.float32)               # (B, T, T)
        s = jnp.where(causal, neg_big, s)

        # Numerically-stable softmax along keys; divide on the EUP.
        m = jnp.max(s, axis=-1, keepdims=True)
        p = jnp.exp(s - m)
        denom = jnp.sum(p, axis=-1, keepdims=True)
        p = p * pl.reciprocal(denom, approx=True)

        # Accumulate directly into the full-width context: the V lane mask
        # zeroes other heads' lanes, so the sum over heads is the concat.
        v_h = jnp.where(in_head, v_all, 0.0)
        ctx = ctx + jax.lax.dot_general(
            p, v_h,
            dimension_numbers=(((2,), (1,)), ((0,), (0,))),
            preferred_element_type=jnp.float32)               # (B, T, d_out)

    # Single output projection for all heads, plus bias.
    out = jnp.dot(ctx.reshape(B * T, d_out), wo_ref[...],
                  preferred_element_type=jnp.float32) + bo_ref[...]
    o_ref[...] = out.reshape(B, T, d_out).astype(o_ref.dtype)


@jax.jit
def multi_head_attention(x, wq, wk, wv, wo, bo):
    """x: (B, T, D_IN); wq/wk/wv/wo pre-transposed to (in, out); bo: (1, D_OUT)."""
    B, T, d_in = x.shape
    d_out = wo.shape[1]

    # Fuse the three projection weights once, at trace time (free).
    wqkv = jnp.concatenate([wq, wk, wv], axis=1)     # (D_IN, 3*D_OUT)

    kernel = functools.partial(mha_kernel, num_heads=NUM_HEADS)

    # Single grid step: the whole (tiny) problem fits in VMEM with huge margin,
    # and per-step grid overhead would dominate the math otherwise.
    # TODO(synk): for larger B on v7x, switch to grid=(B,) with
    # dimension_semantics=("parallel",) to shard across both TensorCores.
    return pl.pallas_call(
        kernel,
        out_shape=jax.ShapeDtypeStruct((B, T, d_out), x.dtype),
        grid_spec=pltpu.PrefetchScalarGridSpec(
            num_scalar_prefetch=0,
            grid=(1,),
            in_specs=[
                pl.BlockSpec((B, T, d_in), lambda i: (0, 0, 0)),
                pl.BlockSpec((d_in, 3 * d_out), lambda i: (0, 0)),
                pl.BlockSpec((d_out, d_out), lambda i: (0, 0)),
                pl.BlockSpec((1, d_out), lambda i: (0, 0)),
            ],
            out_specs=pl.BlockSpec((B, T, d_out), lambda i: (0, 0, 0)),
        ),
        compiler_params=pltpu.CompilerParams(
            dimension_semantics=("arbitrary",),
        ),
    )(x, wqkv, wo, bo)


def reference_mha(x, wq, wk, wv, wo, bo):
    """Pure-JAX reference mirroring the PyTorch forward (eval mode)."""
    B, T, _ = x.shape
    q = x @ wq
    k = x @ wk
    v = x @ wv
    q = q.reshape(B, T, NUM_HEADS, HEAD_DIM).transpose(0, 2, 1, 3)
    k = k.reshape(B, T, NUM_HEADS, HEAD_DIM).transpose(0, 2, 1, 3)
    v = v.reshape(B, T, NUM_HEADS, HEAD_DIM).transpose(0, 2, 1, 3)
    scores = jnp.einsum("bhqd,bhkd->bhqk", q, k)
    mask = jnp.triu(jnp.ones((T, T), dtype=bool), k=1)
    scores = jnp.where(mask[None, None], -jnp.inf, scores)
    w = jax.nn.softmax(scores / math.sqrt(HEAD_DIM), axis=-1)
    ctx = jnp.einsum("bhqk,bhkd->bhqd", w, v).transpose(0, 2, 1, 3)
    ctx = ctx.reshape(B, T, D_OUT)
    return ctx @ wo + bo


if __name__ == "__main__":
    key = jax.random.PRNGKey(0)
    kx, kq, kk, kv, ko, kb = jax.random.split(key, 6)

    x = jax.random.normal(kx, (BATCH, SEQ, D_IN), dtype=jnp.float32)
    # Deterministic parameter init (shapes per nn.Linear; stored pre-transposed).
    wq = jax.random.normal(kq, (D_IN, D_OUT), dtype=jnp.float32) * 0.1
    wk = jax.random.normal(kk, (D_IN, D_OUT), dtype=jnp.float32) * 0.1
    wv = jax.random.normal(kv, (D_IN, D_OUT), dtype=jnp.float32) * 0.1
    wo = jax.random.normal(ko, (D_OUT, D_OUT), dtype=jnp.float32) * 0.1
    bo = jax.random.normal(kb, (1, D_OUT), dtype=jnp.float32) * 0.1

    out = multi_head_attention(x, wq, wk, wv, wo, bo)
    out = jax.block_until_ready(out)

    ref = reference_mha(x, wq, wk, wv, wo, bo)
    assert out.shape == (BATCH, SEQ, D_OUT)
    # Tolerance leaves headroom for the EUP approximate reciprocal in softmax.
    assert jnp.allclose(out, ref, atol=2e-3, rtol=2e-3), "mismatch vs reference"

    print("KERNEL_OK")
</pallas_src>

<mosaic_0001>
module attributes {stable_mosaic.version = 11 : i64} {
  func.func @mha_kernel(%arg0: i32, %arg1: memref<2x8x32xf32, #tpu.memory_space<vmem>>, %arg2: memref<32x96xf32, #tpu.memory_space<vmem>>, %arg3: memref<32x32xf32, #tpu.memory_space<vmem>>, %arg4: memref<1x32xf32, #tpu.memory_space<vmem>>, %arg5: memref<2x8x32xf32, #tpu.memory_space<vmem>>) attributes {dimension_semantics = [#tpu.dimension_semantics<arbitrary>], iteration_bounds = array<i64: 1>, scalar_prefetch = 0 : i64, scratch_operands = 0 : i64, tpu.core_type = #tpu.core_type<tc>, window_params = [{pipeline_mode = #tpu.pipeline_mode<synchronous>, transform_indices = @transform_0, window_bounds = array<i64: 2, 8, 32>}, {pipeline_mode = #tpu.pipeline_mode<synchronous>, transform_indices = @transform_1, window_bounds = array<i64: 32, 96>}, {pipeline_mode = #tpu.pipeline_mode<synchronous>, transform_indices = @transform_2, window_bounds = array<i64: 32, 32>}, {pipeline_mode = #tpu.pipeline_mode<synchronous>, transform_indices = @transform_3, window_bounds = array<i64: 1, 32>}, {pipeline_mode = #tpu.pipeline_mode<synchronous>, transform_indices = @transform_4, window_bounds = array<i64: 2, 8, 32>}]} {
    %c0 = arith.constant 0 : index
    %c0_0 = arith.constant 0 : index
    %c0_1 = arith.constant 0 : index
    %0 = vector.load %arg1[%c0, %c0_0, %c0_1] : memref<2x8x32xf32, #tpu.memory_space<vmem>>, vector<2x8x32xf32>
    %1 = vector.shape_cast %0 : vector<2x8x32xf32> to vector<16x32xf32>
    %c0_2 = arith.constant 0 : index
    %c0_3 = arith.constant 0 : index
    %2 = vector.load %arg2[%c0_2, %c0_3] : memref<32x96xf32, #tpu.memory_space<vmem>>, vector<32x96xf32>
    %cst = arith.constant dense<0.000000e+00> : vector<16x96xf32>
    %3 = tpu.matmul %1, %2, %cst {dimension_numbers = #tpu.dot_dimension_numbers<[1], [0], [0], [1], [0, 0, 1, 1], [], []>} : vector<16x32xf32>, vector<32x96xf32>, vector<16x96xf32> -> vector<16x96xf32>
    %4 = vector.shape_cast %3 : vector<16x96xf32> to vector<2x8x96xf32>
    %5 = vector.extract_strided_slice %4 {offsets = [0, 0, 0], sizes = [2, 8, 32], strides = [1, 1, 1]} : vector<2x8x96xf32> to vector<2x8x32xf32>
    %6 = vector.extract_strided_slice %4 {offsets = [0, 0, 32], sizes = [2, 8, 32], strides = [1, 1, 1]} : vector<2x8x96xf32> to vector<2x8x32xf32>
    %7 = vector.extract_strided_slice %4 {offsets = [0, 0, 64], sizes = [2, 8, 32], strides = [1, 1, 1]} : vector<2x8x96xf32> to vector<2x8x32xf32>
    %8 = tpu.iota {dimensions = array<i32: 2>} : vector<1x1x32xi32>
    %9 = tpu.iota {dimensions = array<i32: 0>} : vector<8x8xi32>
    %10 = tpu.iota {dimensions = array<i32: 1>} : vector<8x8xi32>
    %11 = arith.cmpi sgt, %10, %9 : vector<8x8xi32>
    %12 = vector.shape_cast %11 : vector<8x8xi1> to vector<1x8x8xi1>
    %cst_4 = arith.constant 0.000000e+00 : f32
    %13 = vector.broadcast %cst_4 : f32 to vector<2x8x32xf32>
    %c0_i32 = arith.constant 0 : i32
    %14 = vector.broadcast %c0_i32 : i32 to vector<1x1x32xi32>
    %15 = arith.cmpi sge, %8, %14 : vector<1x1x32xi32>
    %c8_i32 = arith.constant 8 : i32
    %16 = vector.broadcast %c8_i32 : i32 to vector<1x1x32xi32>
    %17 = arith.cmpi slt, %8, %16 : vector<1x1x32xi32>
    %18 = arith.andi %15, %17 : vector<1x1x32xi1>
    %cst_5 = arith.constant 0.353553385 : f32
    %cst_6 = arith.constant 0.000000e+00 : f32
    %19 = vector.broadcast %cst_5 : f32 to vector<1x1x32xf32>
    %20 = vector.broadcast %cst_6 : f32 to vector<1x1x32xf32>
    %21 = arith.select %18, %19, %20 : vector<1x1x32xi1>, vector<1x1x32xf32>
    %22 = vector.broadcast %21 : vector<1x1x32xf32> to vector<2x8x32xf32>
    %23 = arith.mulf %5, %22 : vector<2x8x32xf32>
    %cst_7 = arith.constant dense<0.000000e+00> : vector<2x8x8xf32>
    %24 = tpu.matmul %23, %6, %cst_7 {dimension_numbers = #tpu.dot_dimension_numbers<[2], [2], [1], [1], [0, 0, 0, 1, 1, 1], [0], [0]>} : vector<2x8x32xf32>, vector<2x8x32xf32>, vector<2x8x8xf32> -> vector<2x8x8xf32>
    %cst_8 = arith.constant -3.40282347E+38 : f32
    %25 = vector.shape_cast %12 : vector<1x8x8xi1> to vector<1x8x8xi1>
    %26 = vector.broadcast %25 : vector<1x8x8xi1> to vector<2x8x8xi1>
    %27 = vector.broadcast %cst_8 : f32 to vector<2x8x8xf32>
    %28 = arith.select %26, %27, %24 : vector<2x8x8xi1>, vector<2x8x8xf32>
    %cst_9 = arith.constant dense<0xFF800000> : vector<2x8xf32>
    %29 = vector.multi_reduction <maximumf>, %28, %cst_9 [2] : vector<2x8x8xf32> to vector<2x8xf32>
    %30 = vector.shape_cast %29 : vector<2x8xf32> to vector<2x8x1xf32>
    %31 = vector.broadcast %30 : vector<2x8x1xf32> to vector<2x8x8xf32>
    %32 = arith.subf %28, %31 : vector<2x8x8xf32>
    %33 = math.exp %32 : vector<2x8x8xf32>
    %cst_10 = arith.constant dense<0.000000e+00> : vector<2x8xf32>
    %34 = vector.multi_reduction <add>, %33, %cst_10 [2] : vector<2x8x8xf32> to vector<2x8xf32>
    %35 = vector.shape_cast %34 : vector<2x8xf32> to vector<2x8x1xf32>
    %36 = tpu.reciprocal %35 {approx = true} : vector<2x8x1xf32> -> vector<2x8x1xf32>
    %37 = vector.broadcast %36 : vector<2x8x1xf32> to vector<2x8x8xf32>
    %38 = arith.mulf %33, %37 : vector<2x8x8xf32>
    %cst_11 = arith.constant 0.000000e+00 : f32
    %39 = vector.shape_cast %18 : vector<1x1x32xi1> to vector<1x1x32xi1>
    %40 = vector.broadcast %39 : vector<1x1x32xi1> to vector<2x8x32xi1>
    %41 = vector.broadcast %cst_11 : f32 to vector<2x8x32xf32>
    %42 = arith.select %40, %7, %41 : vector<2x8x32xi1>, vector<2x8x32xf32>
    %cst_12 = arith.constant dense<0.000000e+00> : vector<2x8x32xf32>
    %43 = tpu.matmul %38, %42, %cst_12 {dimension_numbers = #tpu.dot_dimension_numbers<[2], [1], [1], [2], [0, 0, 0, 1, 1, 2], [0], [0]>} : vector<2x8x8xf32>, vector<2x8x32xf32>, vector<2x8x32xf32> -> vector<2x8x32xf32>
    %44 = arith.addf %13, %43 : vector<2x8x32xf32>
    %c8_i32_13 = arith.constant 8 : i32
    %45 = vector.broadcast %c8_i32_13 : i32 to vector<1x1x32xi32>
    %46 = arith.cmpi sge, %8, %45 : vector<1x1x32xi32>
    %c16_i32 = arith.constant 16 : i32
    %47 = vector.broadcast %c16_i32 : i32 to vector<1x1x32xi32>
    %48 = arith.cmpi slt, %8, %47 : vector<1x1x32xi32>
    %49 = arith.andi %46, %48 : vector<1x1x32xi1>
    %cst_14 = arith.constant 0.353553385 : f32
    %cst_15 = arith.constant 0.000000e+00 : f32
    %50 = vector.broadcast %cst_14 : f32 to vector<1x1x32xf32>
    %51 = vector.broadcast %cst_15 : f32 to vector<1x1x32xf32>
    %52 = arith.select %49, %50, %51 : vector<1x1x32xi1>, vector<1x1x32xf32>
    %53 = vector.broadcast %52 : vector<1x1x32xf32> to vector<2x8x32xf32>
    %54 = arith.mulf %5, %53 : vector<2x8x32xf32>
    %cst_16 = arith.constant dense<0.000000e+00> : vector<2x8x8xf32>
    %55 = tpu.matmul %54, %6, %cst_16 {dimension_numbers = #tpu.dot_dimension_numbers<[2], [2], [1], [1], [0, 0, 0, 1, 1, 1], [0], [0]>} : vector<2x8x32xf32>, vector<2x8x32xf32>, vector<2x8x8xf32> -> vector<2x8x8xf32>
    %cst_17 = arith.constant -3.40282347E+38 : f32
    %56 = vector.shape_cast %12 : vector<1x8x8xi1> to vector<1x8x8xi1>
    %57 = vector.broadcast %56 : vector<1x8x8xi1> to vector<2x8x8xi1>
    %58 = vector.broadcast %cst_17 : f32 to vector<2x8x8xf32>
    %59 = arith.select %57, %58, %55 : vector<2x8x8xi1>, vector<2x8x8xf32>
    %cst_18 = arith.constant dense<0xFF800000> : vector<2x8xf32>
    %60 = vector.multi_reduction <maximumf>, %59, %cst_18 [2] : vector<2x8x8xf32> to vector<2x8xf32>
    %61 = vector.shape_cast %60 : vector<2x8xf32> to vector<2x8x1xf32>
    %62 = vector.broadcast %61 : vector<2x8x1xf32> to vector<2x8x8xf32>
    %63 = arith.subf %59, %62 : vector<2x8x8xf32>
    %64 = math.exp %63 : vector<2x8x8xf32>
    %cst_19 = arith.constant dense<0.000000e+00> : vector<2x8xf32>
    %65 = vector.multi_reduction <add>, %64, %cst_19 [2] : vector<2x8x8xf32> to vector<2x8xf32>
    %66 = vector.shape_cast %65 : vector<2x8xf32> to vector<2x8x1xf32>
    %67 = tpu.reciprocal %66 {approx = true} : vector<2x8x1xf32> -> vector<2x8x1xf32>
    %68 = vector.broadcast %67 : vector<2x8x1xf32> to vector<2x8x8xf32>
    %69 = arith.mulf %64, %68 : vector<2x8x8xf32>
    %cst_20 = arith.constant 0.000000e+00 : f32
    %70 = vector.shape_cast %49 : vector<1x1x32xi1> to vector<1x1x32xi1>
    %71 = vector.broadcast %70 : vector<1x1x32xi1> to vector<2x8x32xi1>
    %72 = vector.broadcast %cst_20 : f32 to vector<2x8x32xf32>
    %73 = arith.select %71, %7, %72 : vector<2x8x32xi1>, vector<2x8x32xf32>
    %cst_21 = arith.constant dense<0.000000e+00> : vector<2x8x32xf32>
    %74 = tpu.matmul %69, %73, %cst_21 {dimension_numbers = #tpu.dot_dimension_numbers<[2], [1], [1], [2], [0, 0, 0, 1, 1, 2], [0], [0]>} : vector<2x8x8xf32>, vector<2x8x32xf32>, vector<2x8x32xf32> -> vector<2x8x32xf32>
    %75 = arith.addf %44, %74 : vector<2x8x32xf32>
    %c16_i32_22 = arith.constant 16 : i32
    %76 = vector.broadcast %c16_i32_22 : i32 to vector<1x1x32xi32>
    %77 = arith.cmpi sge, %8, %76 : vector<1x1x32xi32>
    %c24_i32 = arith.constant 24 : i32
    %78 = vector.broadcast %c24_i32 : i32 to vector<1x1x32xi32>
    %79 = arith.cmpi slt, %8, %78 : vector<1x1x32xi32>
    %80 = arith.andi %77, %79 : vector<1x1x32xi1>
    %cst_23 = arith.constant 0.353553385 : f32
    %cst_24 = arith.constant 0.000000e+00 : f32
    %81 = vector.broadcast %cst_23 : f32 to vector<1x1x32xf32>
    %82 = vector.broadcast %cst_24 : f32 to vector<1x1x32xf32>
    %83 = arith.select %80, %81, %82 : vector<1x1x32xi1>, vector<1x1x32xf32>
    %84 = vector.broadcast %83 : vector<1x1x32xf32> to vector<2x8x32xf32>
    %85 = arith.mulf %5, %84 : vector<2x8x32xf32>
    %cst_25 = arith.constant dense<0.000000e+00> : vector<2x8x8xf32>
    %86 = tpu.matmul %85, %6, %cst_25 {dimension_numbers = #tpu.dot_dimension_numbers<[2], [2], [1], [1], [0, 0, 0, 1, 1, 1], [0], [0]>} : vector<2x8x32xf32>, vector<2x8x32xf32>, vector<2x8x8xf32> -> vector<2x8x8xf32>
    %cst_26 = arith.constant -3.40282347E+38 : f32
    %87 = vector.shape_cast %12 : vector<1x8x8xi1> to vector<1x8x8xi1>
    %88 = vector.broadcast %87 : vector<1x8x8xi1> to vector<2x8x8xi1>
    %89 = vector.broadcast %cst_26 : f32 to vector<2x8x8xf32>
    %90 = arith.select %88, %89, %86 : vector<2x8x8xi1>, vector<2x8x8xf32>
    %cst_27 = arith.constant dense<0xFF800000> : vector<2x8xf32>
    %91 = vector.multi_reduction <maximumf>, %90, %cst_27 [2] : vector<2x8x8xf32> to vector<2x8xf32>
    %92 = vector.shape_cast %91 : vector<2x8xf32> to vector<2x8x1xf32>
    %93 = vector.broadcast %92 : vector<2x8x1xf32> to vector<2x8x8xf32>
    %94 = arith.subf %90, %93 : vector<2x8x8xf32>
    %95 = math.exp %94 : vector<2x8x8xf32>
    %cst_28 = arith.constant dense<0.000000e+00> : vector<2x8xf32>
    %96 = vector.multi_reduction <add>, %95, %cst_28 [2] : vector<2x8x8xf32> to vector<2x8xf32>
    %97 = vector.shape_cast %96 : vector<2x8xf32> to vector<2x8x1xf32>
    %98 = tpu.reciprocal %97 {approx = true} : vector<2x8x1xf32> -> vector<2x8x1xf32>
    %99 = vector.broadcast %98 : vector<2x8x1xf32> to vector<2x8x8xf32>
    %100 = arith.mulf %95, %99 : vector<2x8x8xf32>
    %cst_29 = arith.constant 0.000000e+00 : f32
    %101 = vector.shape_cast %80 : vector<1x1x32xi1> to vector<1x1x32xi1>
    %102 = vector.broadcast %101 : vector<1x1x32xi1> to vector<2x8x32xi1>
    %103 = vector.broadcast %cst_29 : f32 to vector<2x8x32xf32>
    %104 = arith.select %102, %7, %103 : vector<2x8x32xi1>, vector<2x8x32xf32>
    %cst_30 = arith.constant dense<0.000000e+00> : vector<2x8x32xf32>
    %105 = tpu.matmul %100, %104, %cst_30 {dimension_numbers = #tpu.dot_dimension_numbers<[2], [1], [1], [2], [0, 0, 0, 1, 1, 2], [0], [0]>} : vector<2x8x8xf32>, vector<2x8x32xf32>, vector<2x8x32xf32> -> vector<2x8x32xf32>
    %106 = arith.addf %75, %105 : vector<2x8x32xf32>
    %c24_i32_31 = arith.constant 24 : i32
    %107 = vector.broadcast %c24_i32_31 : i32 to vector<1x1x32xi32>
    %108 = arith.cmpi sge, %8, %107 : vector<1x1x32xi32>
    %c32_i32 = arith.constant 32 : i32
    %109 = vector.broadcast %c32_i32 : i32 to vector<1x1x32xi32>
    %110 = arith.cmpi slt, %8, %109 : vector<1x1x32xi32>
    %111 = arith.andi %108, %110 : vector<1x1x32xi1>
    %cst_32 = arith.constant 0.353553385 : f32
    %cst_33 = arith.constant 0.000000e+00 : f32
    %112 = vector.broadcast %cst_32 : f32 to vector<1x1x32xf32>
    %113 = vector.broadcast %cst_33 : f32 to vector<1x1x32xf32>
    %114 = arith.select %111, %112, %113 : vector<1x1x32xi1>, vector<1x1x32xf32>
    %115 = vector.broadcast %114 : vector<1x1x32xf32> to vector<2x8x32xf32>
    %116 = arith.mulf %5, %115 : vector<2x8x32xf32>
    %cst_34 = arith.constant dense<0.000000e+00> : vector<2x8x8xf32>
    %117 = tpu.matmul %116, %6, %cst_34 {dimension_numbers = #tpu.dot_dimension_numbers<[2], [2], [1], [1], [0, 0, 0, 1, 1, 1], [0], [0]>} : vector<2x8x32xf32>, vector<2x8x32xf32>, vector<2x8x8xf32> -> vector<2x8x8xf32>
    %cst_35 = arith.constant -3.40282347E+38 : f32
    %118 = vector.shape_cast %12 : vector<1x8x8xi1> to vector<1x8x8xi1>
    %119 = vector.broadcast %118 : vector<1x8x8xi1> to vector<2x8x8xi1>
    %120 = vector.broadcast %cst_35 : f32 to vector<2x8x8xf32>
    %121 = arith.select %119, %120, %117 : vector<2x8x8xi1>, vector<2x8x8xf32>
    %cst_36 = arith.constant dense<0xFF800000> : vector<2x8xf32>
    %122 = vector.multi_reduction <maximumf>, %121, %cst_36 [2] : vector<2x8x8xf32> to vector<2x8xf32>
    %123 = vector.shape_cast %122 : vector<2x8xf32> to vector<2x8x1xf32>
    %124 = vector.broadcast %123 : vector<2x8x1xf32> to vector<2x8x8xf32>
    %125 = arith.subf %121, %124 : vector<2x8x8xf32>
    %126 = math.exp %125 : vector<2x8x8xf32>
    %cst_37 = arith.constant dense<0.000000e+00> : vector<2x8xf32>
    %127 = vector.multi_reduction <add>, %126, %cst_37 [2] : vector<2x8x8xf32> to vector<2x8xf32>
    %128 = vector.shape_cast %127 : vector<2x8xf32> to vector<2x8x1xf32>
    %129 = tpu.reciprocal %128 {approx = true} : vector<2x8x1xf32> -> vector<2x8x1xf32>
    %130 = vector.broadcast %129 : vector<2x8x1xf32> to vector<2x8x8xf32>
    %131 = arith.mulf %126, %130 : vector<2x8x8xf32>
    %cst_38 = arith.constant 0.000000e+00 : f32
    %132 = vector.shape_cast %111 : vector<1x1x32xi1> to vector<1x1x32xi1>
    %133 = vector.broadcast %132 : vector<1x1x32xi1> to vector<2x8x32xi1>
    %134 = vector.broadcast %cst_38 : f32 to vector<2x8x32xf32>
    %135 = arith.select %133, %7, %134 : vector<2x8x32xi1>, vector<2x8x32xf32>
    %cst_39 = arith.constant dense<0.000000e+00> : vector<2x8x32xf32>
    %136 = tpu.matmul %131, %135, %cst_39 {dimension_numbers = #tpu.dot_dimension_numbers<[2], [1], [1], [2], [0, 0, 0, 1, 1, 2], [0], [0]>} : vector<2x8x8xf32>, vector<2x8x32xf32>, vector<2x8x32xf32> -> vector<2x8x32xf32>
    %137 = arith.addf %106, %136 : vector<2x8x32xf32>
    %138 = vector.shape_cast %137 : vector<2x8x32xf32> to vector<16x32xf32>
    %c0_40 = arith.constant 0 : index
    %c0_41 = arith.constant 0 : index
    %139 = vector.load %arg3[%c0_40, %c0_41] : memref<32x32xf32, #tpu.memory_space<vmem>>, vector<32x32xf32>
    %cst_42 = arith.constant dense<0.000000e+00> : vector<16x32xf32>
    %140 = tpu.matmul %138, %139, %cst_42 {dimension_numbers = #tpu.dot_dimension_numbers<[1], [0], [0], [1], [0, 0, 1, 1], [], []>} : vector<16x32xf32>, vector<32x32xf32>, vector<16x32xf32> -> vector<16x32xf32>
    %c0_43 = arith.constant 0 : index
    %c0_44 = arith.constant 0 : index
    %141 = vector.load %arg4[%c0_43, %c0_44] : memref<1x32xf32, #tpu.memory_space<vmem>>, vector<1x32xf32>
    %142 = vector.broadcast %141 : vector<1x32xf32> to vector<16x32xf32>
    %143 = arith.addf %140, %142 : vector<16x32xf32>
    %144 = vector.shape_cast %143 : vector<16x32xf32> to vector<2x8x32xf32>
    %c0_45 = arith.constant 0 : index
    %c0_46 = arith.constant 0 : index
    %c0_47 = arith.constant 0 : index
    %145 = vector.load %arg5[%c0_45, %c0_46, %c0_47] : memref<2x8x32xf32, #tpu.memory_space<vmem>>, vector<2x8x32xf32>
    tpu.vector_store %arg5[%c0_45, %c0_46, %c0_47], %144 {strides = array<i32>} : memref<2x8x32xf32, #tpu.memory_space<vmem>>, vector<2x8x32xf32>,
    return
  }
  func.func @transform_0(%arg0: i32) -> (i32, i32, i32) {
    %c0_i32 = arith.constant 0 : i32
    %c0_i32_0 = arith.constant 0 : i32
    %c0_i32_1 = arith.constant 0 : i32
    %c0_i32_2 = arith.constant 0 : i32
    return %c0_i32, %c0_i32_0, %c0_i32_1 : i32, i32, i32
  }
  func.func @transform_1(%arg0: i32) -> (i32, i32) {
    %c0_i32 = arith.constant 0 : i32
    %c0_i32_0 = arith.constant 0 : i32
    %c0_i32_1 = arith.constant 0 : i32
    return %c0_i32, %c0_i32_0 : i32, i32
  }
  func.func @transform_2(%arg0: i32) -> (i32, i32) {
    %c0_i32 = arith.constant 0 : i32
    %c0_i32_0 = arith.constant 0 : i32
    %c0_i32_1 = arith.constant 0 : i32
    return %c0_i32, %c0_i32_0 : i32, i32
  }
  func.func @transform_3(%arg0: i32) -> (i32, i32) {
    %c0_i32 = arith.constant 0 : i32
    %c0_i32_0 = arith.constant 0 : i32
    %c0_i32_1 = arith.constant 0 : i32
    return %c0_i32, %c0_i32_0 : i32, i32
  }
  func.func @transform_4(%arg0: i32) -> (i32, i32, i32) {
    %c0_i32 = arith.constant 0 : i32
    %c0_i32_0 = arith.constant 0 : i32
    %c0_i32_1 = arith.constant 0 : i32
    %c0_i32_2 = arith.constant 0 : i32
    return %c0_i32, %c0_i32_0, %c0_i32_1 : i32, i32, i32
  }
}

</mosaic_0001>

<bundles_post_ra>
// kernel: multi_head_attention.1
= control target key start
LH: loop header
LB: loop body
LE: loop exit
PB: predicated region body
PF: predicated region fallthrough
CT: control target
= control target key end

     0   :  { %vm24_vm0 = vcmask 261120   ;;  %s2066_s0 = inlined_call_operand.vmem [shape: f32[2,8,32], index: 0, kind: input, shape index: {}]   ;;  %s2067_s1 = inlined_call_operand.vmem [shape: f32[32,96], index: 1, kind: input, shape index: {}]   ;;  %s2068_s2 = inlined_call_operand.vmem [shape: f32[32,32], index: 2, kind: input, shape index: {}]   ;;  %s2069_s3 = inlined_call_operand.vmem [shape: f32[1,32], index: 3, kind: input, shape index: {}]   ;;  %s2070_s4 = inlined_call_operand.hbm [shape: f32[2,8,32], index: 4, kind: output, shape index: {}]  }
   0x1   :  { %v23_v0 = vld [vmem:[%s2067_s1 + $0x18] sm:$0xff]  ;;  %v22_v1 = vld [vmem:[%s2067_s1 + $0x10] sm:$0xff]  ;;  %v18_v2 = vld [vmem:[%s2066_s0] sm:$0xff] }
   0x2   :  { %1629 = vmatprep.subr.mxu0 %v23_v0  ;;  %v21_v3 = vld [vmem:[%s2067_s1 + $0x8] sm:$0xff]  ;;  %1637 = vmatprep.mubr.msk.f32.mxu0 %vm24_vm0, %v18_v2 }
   0x3   :  { %1630 = vmatpush3.msra.mxu0 %v23_v0 }
   0x4   :  { %9 = vsyncpa [#allocation3], 0  ;;  %1631 = vmatprep.subr.mxu0 %v22_v1  ;;  %v20_v4 = vld [vmem:[%s2067_s1] sm:$0xff]  ;;  %v19_v5 = vld [vmem:[%s2066_s0 + $0x8] sm:$0xff]  ;;  %v1792_v6 = vmov 0.0   ;;  %vm1793_vm1 = vmmov 0   ;;  %v106_v9 = vlaneseq }
   0x5   :  { %1632 = vmatpush3.msra.mxu0 %v22_v1  ;;  %1640 = vmatprep.subr.mxu1 %v1792_v6  ;;  %s1794_s0 = smov 96   ;;  %vm277_vm7 = vcmask 64512   ;;  %s1795_s1 = smov 64  }
   0x6   :  { %1633 = vmatprep.subr.mxu0 %v21_v3  ;;  %1642 = vmatprep.mubr.msk.f32.mxu1 %vm1793_vm1, %v1792_v6  ;;  %v1856_v10 = vand.u32 127, %v106_v9  ;;  %v109_v20 = vshrl.u32 %v106_v9, 7  ;;  %s1796_s11 = smov [#allocation2]  }
   0x7   :  { %1634 = vmatpush3.msra.mxu0 %v21_v3  ;;  %s1537_s12 = sshll.u32 %s1796_s11, 4  ;;  %s1538_s12 = int_to_ptr.vmem [resolvable:$true] %s1537_s12 }
   0x8   :  { %1635 = vmatprep.subr.mxu0 %v20_v4  ;;  %vm112_vm2 = vcmp.lt.s32.totalorder %v1856_v10, 8  ;;  %vm310_vm3 = vcmp.ge.s32.totalorder %v1856_v10, 8  ;;  %vm311_vm4 = vcmp.lt.s32.totalorder %v1856_v10, 16  ;;  %vm1904_vm6 = vcmp.gt.s32.totalorder %v1856_v10, %v109_v20  ;;  %p1775_p1 = scmp.lt.s32.totalorder %s1538_s12, %s1538_s12 }
   0x9   :  { %1636 = vmatpush3.msra.mxu0 %v20_v4  ;;  %v114_v12 = vsel %vm112_vm2, 0.35355338, %v1792_v6  ;;  %vm1877_vm5 = vmand %vm310_vm3, %vm311_vm4  ;;  %vm782_vm8 = vcmp.ge.s32.totalorder %v1856_v10, 16  ;;  %vm783_vm9 = vcmp.lt.s32.totalorder %v1856_v10, 24  ;;  %vm1110_vm11 = vcmp.ge.s32.totalorder %v1856_v10, 24 }
   0xa   :  { %1638 = vmatmul.mubr.msk.f32.vlgmr.msra.gmra.mxu0 %vm24_vm0, %v19_v5  ;;  %1660 = vmatprep.subr.mxu0 %v1792_v6  ;;  %v313_v17 = vsel %vm1877_vm5, 0.35355338, %v1792_v6  ;;  %vm1948_vm10 = vmand %vm782_vm8, %vm783_vm9  ;;  %vm1111_vm12 = vcmp.lt.s32.totalorder %v1856_v10, 32 }
   0xb   :  { %1662 = vmatprep.mubr.msk.f32.mxu0 %vm1793_vm1, %v1792_v6  ;;  %vm2001_vm13 = vmand %vm1110_vm11, %vm1111_vm12 }
  0xca   :  { %v1850_v7 = vpop.f32.mrf.mxu0 }
  0xcb   :  { %v116_v16 = vmul.f32 %v1850_v7, %v114_v12  ;;  %v315_v19 = vmul.f32 %v1850_v7, %v313_v17 }
  0xcc   :  { %v1852_v8 = vpop.f32.mrf.mxu0 }
  0xcd   :  { %118 = vrot.lane.b32.xlu0 %v1852_v8, %s1794_s0  ;;  %v115_v13 = vmul.f32 %v114_v12, %v1852_v8  ;;  %v314_v18 = vmul.f32 %v313_v17, %v1852_v8 }
  0xd1   :  { %196 = vrot.lane.b32.xlu0 %v1850_v7, %s1794_s0 }
 0x13f   :  { %v1859_v11 = vpop.permute.xlu0 %118 }
 0x140   :  { %1641 = vmatpush3.xpose.msk.msra.mxu1 %vm24_vm0, %v1859_v11 }
 0x141   :  { %1645 = vmatprep.subr.mxu1 %v1792_v6 }
 0x143   :  { %v1870_v14 = vpop.permute.xlu0 %196  ;;  %1643 = vmatmul.mubr.msk.f32.vlgmr.msra.gmra.mxu1 %vm24_vm0, %v115_v13  ;;  %v785_v13 = vsel %vm1948_vm10, 0.35355338, %v1792_v6 }
 0x144   :  { %1646 = vmatpush3.xpose.msk.msra.mxu1 %vm24_vm0, %v1870_v14  ;;  %1647 = vmatprep.mubr.msk.f32.mxu1 %vm1793_vm1, %v1792_v6  ;;  %v786_v15 = vmul.f32 %v785_v13, %v1852_v8  ;;  %v787_v17 = vmul.f32 %v1850_v7, %v785_v13 }
 0x145   :  { %1650 = vmatprep.subr.mxu1 %v1792_v6 }
 0x147   :  { %1648 = vmatmul.mubr.msk.f32.vlgmr.msra.gmra.mxu1 %vm24_vm0, %v116_v16 }
 0x148   :  { %1651 = vmatpush3.xpose.msk.msra.mxu1 %vm24_vm0, %v1859_v11  ;;  %1652 = vmatprep.mubr.msk.f32.mxu1 %vm1793_vm1, %v1792_v6 }
 0x149   :  { %1655 = vmatprep.subr.mxu1 %v1792_v6 }
 0x14b   :  { %1653 = vmatmul.mubr.msk.f32.vlgmr.msra.gmra.mxu1 %vm24_vm0, %v314_v18 }
 0x14c   :  { %1656 = vmatpush3.xpose.msk.msra.mxu1 %vm24_vm0, %v1870_v14  ;;  %1657 = vmatprep.mubr.msk.f32.mxu1 %vm1793_vm1, %v1792_v6 }
 0x14d   :  { %1665 = vmatprep.subr.mxu1 %v1792_v6 }
 0x14f   :  { %1658 = vmatmul.mubr.msk.f32.vlgmr.msra.gmra.mxu1 %vm24_vm0, %v315_v19 }
 0x150   :  { %1667 = vmatprep.mubr.msk.f32.mxu1 %vm1793_vm1, %v1792_v6 }
 0x203   :  { %v191_v22 = vpop.f32.mrf.mxu1 }
 0x204   :  { %v275_v23 = vsel %vm1904_vm6, -3.4028235e+38, %v191_v22 }
 0x205   :  { %v1644_v24 = vpop.f32.mrf.mxu1  ;;  %v278_v25 = vsel %vm277_vm7, %v275_v23, -inf }
 0x206   :  { %279 = vmax.xlane.f32.xlu0 %v278_v25 }
 0x207   :  { %v269_v26 = vpop.f32.mrf.mxu1 }
 0x208   :  { %v276_v36 = vsel %vm1904_vm6, -3.4028235e+38, %v269_v26 }
 0x209   :  { %v1649_v27 = vpop.f32.mrf.mxu1  ;;  %v281_v37 = vsel %vm277_vm7, %v276_v36, -inf }
 0x20b   :  { %v385_v28 = vpop.f32.mrf.mxu1 }
 0x20c   :  { %v462_v29 = vsel %vm1904_vm6, -3.4028235e+38, %v385_v28 }
 0x20d   :  { %v1654_v30 = vpop.f32.mrf.mxu1  ;;  %v464_v31 = vsel %vm277_vm7, %v462_v29, -inf }
 0x20e   :  { %465 = vmax.xlane.f32.xlu1 %v464_v31 }
 0x20f   :  { %v458_v32 = vpop.f32.mrf.mxu1 }
 0x210   :  { %v463_v33 = vsel %vm1904_vm6, -3.4028235e+38, %v458_v32 }
 0x211   :  { %v1659_v34 = vpop.f32.mrf.mxu1  ;;  %v467_v35 = vsel %vm277_vm7, %v463_v33, -inf }
 0x212   :  { %468 = vmax.xlane.f32.xlu1 %v467_v35 }
 0x216   :  { %282 = vmax.xlane.f32.xlu1 %v281_v37 }
 0x21c   :  { %304 = vrot.lane.b32.xlu0 %v1850_v7, %s1795_s1 }
 0x28f   :  { %v280_v38 = vpop.xlane.xlu0 %279 }
 0x290   :  { %v284_v39 = vsub.f32 %v275_v23, %v280_v38 }
 0x292   :  { %v286_v40 = vmul.f32 1.442695, %v284_v39 }
 0x293   :  { %v1922_v41 = vpop.permute.xlu0 %304 }
 0x294   :  { %1738 = vpow2.f32 %v286_v40  ;;  %1666 = vmatpush3.msk.msra.mxu1 %vm1877_vm5, %v1922_v41 }
 0x295   :  { %1675 = vmatprep.subr.mxu1 %v1792_v6 }
 0x297   :  { %v466_v42 = vpop.xlane.xlu1 %465 }
 0x298   :  { %v470_v44 = vsub.f32 %v462_v29, %v466_v42 }
 0x29a   :  { %v472_v48 = vmul.f32 1.442695, %v470_v44 }
 0x29b   :  { %v469_v43 = vpop.xlane.xlu1 %468 }
 0x29c   :  { %v471_v49 = vsub.f32 %v463_v33, %v469_v43 }
 0x29e   :  { %v474_v52 = vmul.f32 1.442695, %v471_v49 }
 0x29f   :  { %v283_v45 = vpop.xlane.xlu1 %282 }
 0x2a0   :  { %v285_v46 = vsub.f32 %v276_v36, %v283_v45 }
 0x2a1   :  { %v1739_v47 = vpop.eup %1738 }
 0x2a2   :  { %v288_v50 = vmul.f32 1.442695, %v285_v46  ;;  %v290_v51 = vsel %vm277_vm7, %v1739_v47, 0.0 }
 0x2a3   :  { %291 = vadd.xlane.f32.xlu1 %v290_v51 }
 0x2a4   :  { %1740 = vpow2.f32 %v288_v50 }
 0x2a5   :  { %1742 = vpow2.f32 %v472_v48 }
 0x2a6   :  { %1744 = vpow2.f32 %v474_v52 }
 0x2b1   :  { %v1741_v53 = vpop.eup %1740 }
 0x2b2   :  { %v293_v54 = vsel %vm277_vm7, %v1741_v53, 0.0  ;;  %v1743_v55 = vpop.eup %1742 }
 0x2b3   :  { %294 = vadd.xlane.f32.xlu1 %v293_v54  ;;  %v476_v56 = vsel %vm277_vm7, %v1743_v55, 0.0  ;;  %v1745_v57 = vpop.eup %1744  ;;  %v1113_v54 = vsel %vm2001_vm13, 0.35355338, %v1792_v6 }
 0x2b4   :  { %v479_v58 = vsel %vm277_vm7, %v1745_v57, 0.0  ;;  %v1114_v10 = vmul.f32 %v1113_v54, %v1852_v8 }
 0x2b7   :  { %477 = vadd.xlane.f32.xlu1 %v476_v56 }
 0x2bb   :  { %480 = vadd.xlane.f32.xlu1 %v479_v58 }
 0x2cc   :  { %302 = vrot.lane.b32.xlu1 %v1852_v8, %s1795_s1 }
 0x32c   :  { %v292_v59 = vpop.xlane.xlu1 %291 }
 0x33c   :  { %v295_v60 = vpop.xlane.xlu1 %294 }
 0x340   :  { %v478_v61 = vpop.xlane.xlu1 %477 }
 0x341   :  { %1746 = vrcp.f32 %v478_v61 }
 0x342   :  { %1748 = vrcp.f32 %v292_v59 }
 0x344   :  { %v481_v62 = vpop.xlane.xlu1 %480 }
 0x345   :  { %1750 = vrcp.f32 %v481_v62 }
 0x346   :  { %1752 = vrcp.f32 %v295_v60 }
 0x348   :  { %v1934_v63 = vpop.permute.xlu1 %302 }
 0x349   :  { %1661 = vmatpush3.msk.msra.mxu0 %vm1877_vm5, %v1934_v63 }
 0x34a   :  { %1670 = vmatprep.subr.mxu0 %v1792_v6 }
 0x34e   :  { %v1747_v0 = vpop.eup %1746 }
 0x34f   :  { %v484_v1 = vmul.f32 %v1747_v0, %v1743_v55  ;;  %v1749_v2 = vpop.eup %1748 }
 0x350   :  { %v298_v9 = vmul.f32 %v1749_v2, %v1739_v47 }
 0x351   :  { %1663 = vmatmul.mubr.msk.f32.vlgmr.msra.gmra.mxu0 %vm277_vm7, %v484_v1 }
 0x352   :  { %v1751_v3 = vpop.eup %1750  ;;  %1671 = vmatpush3.msk.msra.mxu0 %vm112_vm2, %v1934_v63  ;;  %1672 = vmatprep.mubr.msk.f32.mxu0 %vm1793_vm1, %v1792_v6 }
 0x353   :  { %1680 = vmatprep.subr.mxu0 %v1792_v6  ;;  %v485_v5 = vmul.f32 %v1751_v3, %v1745_v57  ;;  %v1753_v12 = vpop.eup %1752 }
 0x354   :  { %v299_v16 = vmul.f32 %v1753_v12, %v1741_v53 }
 0x355   :  { %1668 = vmatmul.mubr.msk.f32.vlgmr.msra.gmra.mxu1 %vm277_vm7, %v485_v5  ;;  %1673 = vmatmul.mubr.msk.f32.vlgmr.msra.gmra.mxu0 %vm277_vm7, %v298_v9 }
 0x356   :  { %1676 = vmatpush3.msk.msra.mxu1 %vm112_vm2, %v1922_v41  ;;  %1681 = vmatpush3.xpose.msk.msra.mxu0 %vm24_vm0, %v1859_v11 }
 0x357   :  { %1677 = vmatprep.mubr.msk.f32.mxu1 %vm1793_vm1, %v1792_v6  ;;  %1682 = vmatprep.mubr.msk.f32.mxu0 %vm1793_vm1, %v1792_v6 }
 0x358   :  { %1685 = vmatprep.subr.mxu1 %v1792_v6  ;;  %1690 = vmatprep.subr.mxu0 %v1792_v6 }
 0x359   :  { %1678 = vmatmul.mubr.msk.f32.vlgmr.msra.gmra.mxu1 %vm277_vm7, %v299_v16  ;;  %1683 = vmatmul.mubr.msk.f32.vlgmr.msra.gmra.mxu0 %vm24_vm0, %v786_v15  ;;  %v1441_v16 = vld [vmem:[%s2068_s2 + $0x18] sm:$0xff] }
 0x35a   :  { %1686 = vmatpush3.xpose.msk.msra.mxu1 %vm24_vm0, %v1870_v14  ;;  %1691 = vmatpush3.msk.msra.mxu0 %vm1948_vm10, %v1934_v63 }
 0x35b   :  { %1687 = vmatprep.mubr.msk.f32.mxu1 %vm1793_vm1, %v1792_v6  ;;  %1695 = vmatprep.subr.mxu1 %v1792_v6 }
 0x35c   :  { %1692 = vmatprep.mubr.msk.f32.mxu0 %vm1793_vm1, %v1792_v6  ;;  %1700 = vmatprep.subr.mxu0 %v1792_v6 }
 0x35d   :  { %1688 = vmatmul.mubr.msk.f32.vlgmr.msra.gmra.mxu1 %vm24_vm0, %v787_v17 }
 0x35e   :  { %1696 = vmatpush3.msk.msra.mxu1 %vm1948_vm10, %v1922_v41  ;;  %1697 = vmatprep.mubr.msk.f32.mxu1 %vm1793_vm1, %v1792_v6 }
 0x35f   :  { %1705 = vmatprep.subr.mxu1 %v1792_v6 }
 0x411   :  { %v559_v18 = vpop.f32.mrf.mxu0 }
 0x413   :  { %v1664_v19 = vpop.f32.mrf.mxu0 }
 0x415   :  { %v632_v20 = vpop.f32.mrf.mxu1  ;;  %v705_v22 = vpop.f32.mrf.mxu0 }
 0x416   :  { %v706_v23 = vadd.f32 %v705_v22, %v559_v18 }
 0x417   :  { %v1669_v24 = vpop.f32.mrf.mxu1  ;;  %v1674_v25 = vpop.f32.mrf.mxu0 }
 0x418   :  { %v1440_v24 = vld [vmem:[%s2068_s2 + $0x10] sm:$0xff]  ;;  %v1439_v25 = vld [vmem:[%s2068_s2 + $0x8] sm:$0xff] }
 0x419   :  { %v778_v26 = vpop.f32.mrf.mxu1  ;;  %v857_v27 = vpop.f32.mrf.mxu0 }
 0x41a   :  { %v779_v28 = vadd.f32 %v778_v26, %v632_v20  ;;  %v934_v29 = vsel %vm1904_vm6, -3.4028235e+38, %v857_v27  ;;  %v1438_v26 = vld [vmem:[%s2068_s2] sm:$0xff]  ;;  %s1770_s2 = scalar_lea.vmem %s1538_s12, 256 }
 0x41b   :  { %v1679_v30 = vpop.f32.mrf.mxu1  ;;  %v1684_v31 = vpop.f32.mrf.mxu0  ;;  %v936_v32 = vsel %vm277_vm7, %v934_v29, -inf  ;;  %p1771_p0 = scmp.ne.s32.totalorder %s1538_s12, %s1770_s2  ;;  %p1776_p2 = scmp.lt.s32.totalorder %s1770_s2, %s1770_s2 }
 0x41c   :  { %937 = vmax.xlane.f32.xlu1 %v936_v32 }
 0x41d   :  { %v930_v33 = vpop.f32.mrf.mxu1  ;;  %p1777_p3 = por %p1776_p2, %p1775_p1 }
 0x41e   :  { %v935_v34 = vsel %vm1904_vm6, -3.4028235e+38, %v930_v33  ;;  %v1582_v33 = vld [vmem:[%s2069_s3] ss:$0 sm:$0xff] }
 0x41f   :  { %v1689_v35 = vpop.f32.mrf.mxu1  ;;  %v939_v36 = vsel %vm277_vm7, %v935_v34, -inf  ;;  %p1778_p4 = pnand %p1777_p3, %p1771_p0 }
 0x420   :  { %940 = vmax.xlane.f32.xlu0 %v939_v36 }
 0x4a5   :  { %v938_v37 = vpop.xlane.xlu1 %937 }
 0x4a6   :  { %v942_v38 = vsub.f32 %v934_v29, %v938_v37 }
 0x4a8   :  { %v944_v39 = vmul.f32 1.442695, %v942_v38 }
 0x4a9   :  { %v941_v40 = vpop.xlane.xlu0 %940 }
 0x4aa   :  { %1754 = vpow2.f32 %v944_v39  ;;  %v943_v42 = vsub.f32 %v935_v34, %v941_v40 }
 0x4ac   :  { %v946_v43 = vmul.f32 1.442695, %v943_v42 }
 0x4ae   :  { %1756 = vpow2.f32 %v946_v43 }
 0x4b7   :  { %v1755_v44 = vpop.eup %1754 }
 0x4b8   :  { %v948_v45 = vsel %vm277_vm7, %v1755_v44, 0.0 }
 0x4b9   :  { %949 = vadd.xlane.f32.xlu1 %v948_v45 }
 0x4bb   :  { %v1757_v46 = vpop.eup %1756 }
 0x4bc   :  { %v951_v47 = vsel %vm277_vm7, %v1757_v46, 0.0 }
 0x4bd   :  { %952 = vadd.xlane.f32.xlu1 %v951_v47 }
 0x542   :  { %v950_v48 = vpop.xlane.xlu1 %949 }
 0x543   :  { %1758 = vrcp.f32 %v950_v48 }
 0x546   :  { %v953_v49 = vpop.xlane.xlu1 %952 }
 0x547   :  { %1760 = vrcp.f32 %v953_v49 }
 0x550   :  { %v1759_v50 = vpop.eup %1758 }
 0x551   :  { %v956_v52 = vmul.f32 %v1759_v50, %v1755_v44 }
 0x553   :  { %1693 = vmatmul.mubr.msk.f32.vlgmr.msra.gmra.mxu0 %vm277_vm7, %v956_v52 }
 0x554   :  { %v1761_v53 = vpop.eup %1760  ;;  %1701 = vmatpush3.xpose.msk.msra.mxu0 %vm24_vm0, %v1859_v11  ;;  %1702 = vmatprep.mubr.msk.f32.mxu0 %vm1793_vm1, %v1792_v6  ;;  %v1115_v11 = vmul.f32 %v1850_v7, %v1113_v54 }
 0x555   :  { %1710 = vmatprep.subr.mxu0 %v1792_v6  ;;  %v957_v55 = vmul.f32 %v1761_v53, %v1757_v46 }
 0x557   :  { %1698 = vmatmul.mubr.msk.f32.vlgmr.msra.gmra.mxu1 %vm277_vm7, %v957_v55  ;;  %1703 = vmatmul.mubr.msk.f32.vlgmr.msra.gmra.mxu0 %vm24_vm0, %v1114_v10 }
 0x558   :  { %1706 = vmatpush3.xpose.msk.msra.mxu1 %vm24_vm0, %v1870_v14  ;;  %1711 = vmatpush3.msk.msra.mxu0 %vm2001_vm13, %v1934_v63 }
 0x559   :  { %1707 = vmatprep.mubr.msk.f32.mxu1 %vm1793_vm1, %v1792_v6  ;;  %1715 = vmatprep.subr.mxu1 %v1792_v6 }
 0x55a   :  { %1712 = vmatprep.mubr.msk.f32.mxu0 %vm1793_vm1, %v1792_v6  ;;  %1720 = vmatprep.subr.mxu0 %v1441_v16 }
 0x55b   :  { %1708 = vmatmul.mubr.msk.f32.vlgmr.msra.gmra.mxu1 %vm24_vm0, %v1115_v11 }
 0x55c   :  { %1716 = vmatpush3.msk.msra.mxu1 %vm2001_vm13, %v1922_v41  ;;  %1717 = vmatprep.mubr.msk.f32.mxu1 %vm1793_vm1, %v1792_v6 }
 0x613   :  { %v1031_v8 = vpop.f32.mrf.mxu0 }
 0x614   :  { %v1108_v14 = vadd.f32 %v1031_v8, %v706_v23 }
 0x615   :  { %v1694_v7 = vpop.f32.mrf.mxu0 }
 0x617   :  { %v1104_v56 = vpop.f32.mrf.mxu1  ;;  %v1185_v57 = vpop.f32.mrf.mxu0 }
 0x618   :  { %v1109_v58 = vadd.f32 %v1104_v56, %v779_v28  ;;  %v1262_v59 = vsel %vm1904_vm6, -3.4028235e+38, %v1185_v57 }
 0x619   :  { %v1699_v60 = vpop.f32.mrf.mxu1  ;;  %v1704_v61 = vpop.f32.mrf.mxu0  ;;  %v1264_v62 = vsel %vm277_vm7, %v1262_v59, -inf }
 0x61a   :  { %1265 = vmax.xlane.f32.xlu1 %v1264_v62 }
 0x61b   :  { %v1258_v63 = vpop.f32.mrf.mxu1 }
 0x61c   :  { %v1263_v41 = vsel %vm1904_vm6, -3.4028235e+38, %v1258_v63 }
 0x61d   :  { %v1709_v0 = vpop.f32.mrf.mxu1  ;;  %v1267_v6 = vsel %vm277_vm7, %v1263_v41, -inf }
 0x61e   :  { %1268 = vmax.xlane.f32.xlu0 %v1267_v6 }
 0x6a3   :  { %v1266_v1 = vpop.xlane.xlu1 %1265 }
 0x6a4   :  { %v1270_v2 = vsub.f32 %v1262_v59, %v1266_v1 }
 0x6a6   :  { %v1272_v3 = vmul.f32 1.442695, %v1270_v2 }
 0x6a7   :  { %v1269_v4 = vpop.xlane.xlu0 %1268 }
 0x6a8   :  { %1762 = vpow2.f32 %v1272_v3  ;;  %v1271_v5 = vsub.f32 %v1263_v41, %v1269_v4 }
 0x6aa   :  { %v1274_v9 = vmul.f32 1.442695, %v1271_v5 }
 0x6ac   :  { %1764 = vpow2.f32 %v1274_v9 }
 0x6b5   :  { %v1763_v12 = vpop.eup %1762 }
 0x6b6   :  { %v1276_v13 = vsel %vm277_vm7, %v1763_v12, 0.0 }
 0x6b7   :  { %1277 = vadd.xlane.f32.xlu1 %v1276_v13 }
 0x6b9   :  { %v1765_v15 = vpop.eup %1764 }
 0x6ba   :  { %v1279_v21 = vsel %vm277_vm7, %v1765_v15, 0.0 }
 0x6bb   :  { %1280 = vadd.xlane.f32.xlu0 %v1279_v21 }
 0x740   :  { %v1278_v17 = vpop.xlane.xlu1 %1277 }
 0x741   :  { %1766 = vrcp.f32 %v1278_v17 }
 0x744   :  { %v1281_v18 = vpop.xlane.xlu0 %1280 }
 0x745   :  { %1768 = vrcp.f32 %v1281_v18 }
 0x74e   :  { %v1767_v19 = vpop.eup %1766 }
 0x74f   :  { %v1284_v20 = vmul.f32 %v1767_v19, %v1763_v12 }
 0x751   :  { %1713 = vmatmul.mubr.msk.f32.vlgmr.msra.gmra.mxu0 %vm277_vm7, %v1284_v20 }
 0x752   :  { %v1769_v22 = vpop.eup %1768  ;;  %1721 = vmatpush3.msra.mxu0 %v1441_v16 }
 0x753   :  { %v1285_v23 = vmul.f32 %v1769_v22, %v1765_v15  ;;  %1722 = vmatprep.subr.mxu0 %v1440_v24 }
 0x754   :  { %1723 = vmatpush3.msra.mxu0 %v1440_v24 }
 0x755   :  { %1718 = vmatmul.mubr.msk.f32.vlgmr.msra.gmra.mxu1 %vm277_vm7, %v1285_v23  ;;  %1724 = vmatprep.subr.mxu0 %v1439_v25 }
 0x756   :  { %1725 = vmatpush3.msra.mxu0 %v1439_v25 }
 0x757   :  { %1726 = vmatprep.subr.mxu0 %v1438_v26 }
 0x758   :  { %1727 = vmatpush3.msra.mxu0 %v1438_v26 }
 0x811   :  { %v1359_v27 = vpop.f32.mrf.mxu0 }
 0x812   :  { %v1436_v28 = vadd.f32 %v1359_v27, %v1108_v14 }
 0x813   :  { %v1714_v29 = vpop.f32.mrf.mxu0 }
 0x814   :  { %1728 = vmatprep.mubr.msk.f32.mxu0 %vm24_vm0, %v1436_v28 }
 0x815   :  { %v1432_v30 = vpop.f32.mrf.mxu1 }
 0x816   :  { %v1437_v31 = vadd.f32 %v1432_v30, %v1109_v58 }
 0x817   :  { %v1719_v32 = vpop.f32.mrf.mxu1 }
 0x818   :  { %1729 = vmatmul.mubr.msk.f32.vlgmr.msra.gmra.mxu0 %vm24_vm0, %v1437_v31 }
 0x8d8   :  { %v1730_v34 = vpop.f32.mrf.mxu0 }
 0x8d9   :  { %v1527_v35 = vadd.f32 %v1730_v34, %v1582_v33 }
 0x8da   :  { %v1521_v36 = vpop.f32.mrf.mxu0 }
 0x8db   :  { %1531 = vst.msk [vmem:[#allocation2 + $0x8] sm:$0xff] %vm24_vm0, %v1527_v35  ;;  %v1522_v37 = vadd.f32 %v1582_v33, %v1521_v36 }
 0x8dd   :  { %1530 = vst.msk [vmem:[#allocation2] sm:$0xff] %vm24_vm0, %v1522_v37 }
 0x8de   :  { %1781 = shalt.err (!%p1778_p4)
}
 0x8df   :  { %s1797_s13 = smov 128   ;;  %s1798_s3 = smov 8  }
 0x8e0   :  { %1543 = dma.vmem_to_hbm [thread:$0]  %s1538_s12, 256, %s2070_s4, [#allocation3], %s1797_s13, %s1797_s13, %s1798_s3  }
 0x8e1   :  { %1790 = dma.done.wait [#allocation3], 256  }
 0x8e2   :  { %1791 = vsyncadd [#allocation3], 4294967040 }
 0x8e3   :  { %1547 = vsyncpa [#allocation3], 1 }

</bundles_post_ra>
